<compile_context>
chip_gen: v7x
topology: tpu7x:2x2x1
jax: 0.10.0
libtpu: 0.0.40
codegen_flags: <defaults>
</compile_context>

<pallas_src>
import functools

import jax
import jax.numpy as jnp
from jax.experimental import pallas as pl
from jax.experimental.pallas import tpu as pltpu


def _prenorm_kernel(x_ref, gamma_ref, beta_ref, w_ref, bfn_ref, o_ref, xn_ref,
                    *, eps, inv_d):
    # x_ref: (TM, D); gamma/beta: (1, D) f32; w: (D, TN); bfn: (1, TN) f32
    # o_ref: (TM, TN); xn_ref: (TM, D) VMEM scratch in the matmul dtype.

    # LayerNorm + affine is computed once per row tile (on the first DOUT
    # tile only) and cached in VMEM for the remaining j steps.
    @pl.when(pl.program_id(1) == 0)
    def _():
        x = x_ref[...].astype(jnp.float32)
        # Two-pass statistics (PyTorch LayerNorm semantics, biased variance);
        # avoids E[x^2]-E[x]^2 cancellation for non-centered inputs.
        mean = jnp.sum(x, axis=-1, keepdims=True) * inv_d
        xc = x - mean
        var = jnp.sum(xc * xc, axis=-1, keepdims=True) * inv_d
        inv = jax.lax.rsqrt(var + eps)
        xn = xc * inv * gamma_ref[...] + beta_ref[...]
        xn_ref[...] = xn.astype(xn_ref.dtype)

    # fn = Linear: MXU matmul in the scratch/W dtype with f32 accumulation.
    y = jnp.dot(xn_ref[...], w_ref[...], preferred_element_type=jnp.float32)
    o_ref[...] = (y + bfn_ref[...]).astype(o_ref.dtype)


def _round_up(v, m):
    return ((v + m - 1) // m) * m


def prenorm(x, gamma, beta, w_fn, b_fn, *, eps=1e-6, tile_rows=512,
            tile_cols=512, matmul_dtype=None, vmem_limit_bytes=None):
    """PreNorm forward: fn(LayerNorm(x)) with fn = Linear.

    x:      (B, N, D)
    gamma:  (D,)       LayerNorm weight
    beta:   (D,)       LayerNorm bias
    w_fn:   (D, DOUT)  Linear weight, laid out (in, out)
    b_fn:   (DOUT,)    Linear bias
    matmul_dtype: dtype the matmul runs in (f32 accumulation). Defaults to
                  bf16 for bf16 inputs, W's dtype otherwise.
    returns (B, N, DOUT)
    """
    B, N, D = x.shape
    DOUT = w_fn.shape[1]
    rows = B * N

    if matmul_dtype is None:
        matmul_dtype = jnp.bfloat16 if x.dtype == jnp.bfloat16 else w_fn.dtype
    mm_dtype = jax.dtypes.canonicalize_dtype(matmul_dtype)

    x2 = x.reshape(rows, D)
    gamma2 = gamma.reshape(1, D).astype(jnp.float32)   # pre-cast once
    beta2 = beta.reshape(1, D).astype(jnp.float32)
    bfn2 = b_fn.reshape(1, DOUT).astype(jnp.float32)
    w_fn = w_fn.astype(mm_dtype)

    # ---- tile selection ----------------------------------------------------
    sub = 16 if x.dtype == jnp.bfloat16 else 8
    bx = x2.dtype.itemsize
    bw = mm_dtype.itemsize
    bo = x.dtype.itemsize
    headroom = 4 << 20

    tm = max(sub, min(_round_up(tile_rows, sub), _round_up(rows, sub)))
    # v7x megacore: keep >= 2 blocks on the parallel row axis when possible.
    if rows >= 2 * sub and pl.cdiv(rows, tm) < 2:
        tm = max(sub, _round_up(pl.cdiv(rows, 2), sub))

    def cost(tm_, tn_):
        return (2 * tm_ * D * bx            # x tile (double-buffered)
                + 2 * D * tn_ * bw          # W stripe (double-buffered)
                + 2 * tm_ * tn_ * bo        # out tile (double-buffered)
                + tm_ * D * bw              # xn scratch (single-buffered)
                + 2 * (2 * D + tn_) * 4)    # gamma/beta/bias (f32)

    if vmem_limit_bytes is None:
        try:
            capacity = getattr(pltpu.get_tpu_info(), "vmem_capacity_bytes",
                               64 << 20)
        except Exception:  # unknown chip / interpret mode
            capacity = 64 << 20             # v7x per-core (smallest)
        budget = (capacity * 3) // 4        # leave compiler-scratch headroom
    else:
        budget = vmem_limit_bytes

    # Prefer keeping the whole W resident (tn = DOUT): LayerNorm then runs
    # exactly once per row tile and W is streamed from HBM exactly once.
    tn = DOUT
    if cost(tm, tn) + headroom > budget:
        # W too big to keep fully resident: tile DOUT in lane-dense
        # 128-multiples and shrink until the budget fits (tn first, tm last).
        tn = max(128, min(_round_up(tile_cols, 128), _round_up(DOUT, 128)))
        while cost(tm, tn) + headroom > budget and tn > 128:
            tn = max(128, ((tn // 2) // 128) * 128)
        while cost(tm, tn) + headroom > budget and tm > 2 * sub:
            tm = max(sub, ((tm // 2) // sub) * sub)

    if vmem_limit_bytes is None:
        vmem_limit_bytes = int(min(max(cost(tm, tn) + headroom, 32 << 20),
                                   budget))

    grid = (pl.cdiv(rows, tm), pl.cdiv(DOUT, tn))

    kernel = functools.partial(_prenorm_kernel, eps=eps, inv_d=1.0 / D)

    # TODO(synk): W/gamma/beta could be single-buffered (pipeline_mode) when
    # their block index is constant; left double-buffered for portability.
    out2 = pl.pallas_call(
        kernel,
        out_shape=jax.ShapeDtypeStruct((rows, DOUT), x.dtype),
        grid_spec=pltpu.PrefetchScalarGridSpec(
            num_scalar_prefetch=0,
            grid=grid,
            in_specs=[
                pl.BlockSpec((tm, D), lambda i, j: (i, 0)),    # x tile
                pl.BlockSpec((1, D), lambda i, j: (0, 0)),     # gamma (f32)
                pl.BlockSpec((1, D), lambda i, j: (0, 0)),     # beta  (f32)
                pl.BlockSpec((D, tn), lambda i, j: (0, j)),    # W stripe
                pl.BlockSpec((1, tn), lambda i, j: (0, j)),    # b_fn  (f32)
            ],
            out_specs=pl.BlockSpec((tm, tn), lambda i, j: (i, j)),
            scratch_shapes=[pltpu.VMEM((tm, D), mm_dtype)],    # cached xn
        ),
        compiler_params=pltpu.CompilerParams(
            # i: independent row tiles (megacore-shardable).
            # j: "arbitrary" so the xn scratch written at j == 0 is reused
            #    (not recomputed) by the remaining DOUT tiles of the same i.
            dimension_semantics=("parallel", "arbitrary"),
            vmem_limit_bytes=vmem_limit_bytes),
    )(x2, gamma2, beta2, w_fn, bfn2)

    return out2.reshape(B, N, DOUT)


def _reference(x, gamma, beta, w_fn, b_fn, eps=1e-6):
    xf = x.astype(jnp.float32)
    mean = jnp.mean(xf, axis=-1, keepdims=True)
    var = jnp.mean((xf - mean) ** 2, axis=-1, keepdims=True)
    xn = (xf - mean) / jnp.sqrt(var + eps) * gamma.astype(jnp.float32) \
         + beta.astype(jnp.float32)
    return xn @ w_fn.astype(jnp.float32) + b_fn.astype(jnp.float32)


if __name__ == "__main__":
    key = jax.random.PRNGKey(0)
    kx, kw, kb, kx2, kw2, kb2 = jax.random.split(key, 6)

    # --- Test 1: small f32 shapes (exact path) ------------------------------
    B, N, D = 2, 8, 32
    x = jax.random.normal(kx, (B, N, D), dtype=jnp.float32)
    gamma = jnp.ones((D,), dtype=jnp.float32)   # PyTorch LayerNorm default init
    beta = jnp.zeros((D,), dtype=jnp.float32)
    w_fn = jax.random.normal(kw, (D, D), dtype=jnp.float32) * (1.0 / D ** 0.5)
    b_fn = jax.random.normal(kb, (D,), dtype=jnp.float32) * 0.01

    out = jax.block_until_ready(prenorm(x, gamma, beta, w_fn, b_fn))
    ref = _reference(x, gamma, beta, w_fn, b_fn)
    assert out.shape == (B, N, D), out.shape
    assert jnp.allclose(out, ref, atol=1e-4, rtol=1e-4), "f32 mismatch vs reference"

    # --- Test 2: lane-dense bf16 fast path (D multiple of 128, bf16 MXU) ----
    B2, N2, D2 = 2, 64, 128
    xb = jax.random.normal(kx2, (B2, N2, D2), dtype=jnp.float32).astype(jnp.bfloat16)
    gb = jnp.ones((D2,), dtype=jnp.float32)
    bb = jnp.zeros((D2,), dtype=jnp.float32)
    wb = jax.random.normal(kw2, (D2, D2), dtype=jnp.float32) * (1.0 / D2 ** 0.5)
    bfb = jax.random.normal(kb2, (D2,), dtype=jnp.float32) * 0.01

    outb = jax.block_until_ready(
        prenorm(xb, gb, bb, wb, bfb, matmul_dtype=jnp.bfloat16))
    refb = _reference(xb, gb, bb, wb, bfb)
    assert outb.shape == (B2, N2, D2), outb.shape
    assert jnp.allclose(outb.astype(jnp.float32), refb,
                        atol=1e-1, rtol=1e-1), "bf16 mismatch vs reference"

    print("KERNEL_OK")
</pallas_src>

<mosaic_0001>
module attributes {stable_mosaic.version = 11 : i64} {
  func.func @_prenorm_kernel(%arg0: i32, %arg1: i32, %arg2: memref<8x32xf32, #tpu.memory_space<vmem>>, %arg3: memref<1x32xf32, #tpu.memory_space<vmem>>, %arg4: memref<1x32xf32, #tpu.memory_space<vmem>>, %arg5: memref<32x32xf32, #tpu.memory_space<vmem>>, %arg6: memref<1x32xf32, #tpu.memory_space<vmem>>, %arg7: memref<8x32xf32, #tpu.memory_space<vmem>>, %arg8: memref<8x32xf32, #tpu.memory_space<vmem>>) attributes {dimension_semantics = [#tpu.dimension_semantics<parallel>, #tpu.dimension_semantics<arbitrary>], iteration_bounds = array<i64: 2, 1>, scalar_prefetch = 0 : i64, scratch_operands = 1 : i64, tpu.core_type = #tpu.core_type<tc>, window_params = [{transform_indices = @transform_0, window_bounds = array<i64: 8, 32>}, {pipeline_mode = #tpu.pipeline_mode<synchronous>, transform_indices = @transform_1, window_bounds = array<i64: 1, 32>}, {pipeline_mode = #tpu.pipeline_mode<synchronous>, transform_indices = @transform_2, window_bounds = array<i64: 1, 32>}, {transform_indices = @transform_3, window_bounds = array<i64: 32, 32>}, {transform_indices = @transform_4, window_bounds = array<i64: 1, 32>}, {transform_indices = @transform_5, window_bounds = array<i64: 8, 32>}]} {
    %c0_i32 = arith.constant 0 : i32
    %0 = arith.cmpi eq, %arg1, %c0_i32 : i32
    %1 = arith.extui %0 : i1 to i32
    %c0_i32_0 = arith.constant 0 : i32
    %2 = arith.cmpi ne, %1, %c0_i32_0 : i32
    scf.if %2 {
      %c0_8 = arith.constant 0 : index
      %c0_9 = arith.constant 0 : index
      %10 = vector.load %arg2[%c0_8, %c0_9] : memref<8x32xf32, #tpu.memory_space<vmem>>, vector<8x32xf32>
      %cst_10 = arith.constant dense<0.000000e+00> : vector<8xf32>
      %11 = vector.multi_reduction <add>, %10, %cst_10 [1] : vector<8x32xf32> to vector<8xf32>
      %12 = vector.shape_cast %11 : vector<8xf32> to vector<8x1xf32>
      %cst_11 = arith.constant 3.125000e-02 : f32
      %13 = vector.broadcast %cst_11 : f32 to vector<8x1xf32>
      %14 = arith.mulf %12, %13 : vector<8x1xf32>
      %15 = vector.broadcast %14 : vector<8x1xf32> to vector<8x32xf32>
      %16 = arith.subf %10, %15 : vector<8x32xf32>
      %17 = arith.mulf %16, %16 : vector<8x32xf32>
      %cst_12 = arith.constant dense<0.000000e+00> : vector<8xf32>
      %18 = vector.multi_reduction <add>, %17, %cst_12 [1] : vector<8x32xf32> to vector<8xf32>
      %19 = vector.shape_cast %18 : vector<8xf32> to vector<8x1xf32>
      %cst_13 = arith.constant 3.125000e-02 : f32
      %20 = vector.broadcast %cst_13 : f32 to vector<8x1xf32>
      %21 = arith.mulf %19, %20 : vector<8x1xf32>
      %cst_14 = arith.constant 9.99999997E-7 : f32
      %22 = vector.broadcast %cst_14 : f32 to vector<8x1xf32>
      %23 = arith.addf %21, %22 : vector<8x1xf32>
      %24 = math.rsqrt %23 : vector<8x1xf32>
      %25 = vector.broadcast %24 : vector<8x1xf32> to vector<8x32xf32>
      %26 = arith.mulf %16, %25 : vector<8x32xf32>
      %c0_15 = arith.constant 0 : index
      %c0_16 = arith.constant 0 : index
      %27 = vector.load %arg3[%c0_15, %c0_16] : memref<1x32xf32, #tpu.memory_space<vmem>>, vector<1x32xf32>
      %28 = vector.broadcast %27 : vector<1x32xf32> to vector<8x32xf32>
      %29 = arith.mulf %26, %28 : vector<8x32xf32>
      %c0_17 = arith.constant 0 : index
      %c0_18 = arith.constant 0 : index
      %30 = vector.load %arg4[%c0_17, %c0_18] : memref<1x32xf32, #tpu.memory_space<vmem>>, vector<1x32xf32>
      %31 = vector.broadcast %30 : vector<1x32xf32> to vector<8x32xf32>
      %32 = arith.addf %29, %31 : vector<8x32xf32>
      %c0_19 = arith.constant 0 : index
      %c0_20 = arith.constant 0 : index
      %33 = vector.load %arg8[%c0_19, %c0_20] : memref<8x32xf32, #tpu.memory_space<vmem>>, vector<8x32xf32>
      tpu.vector_store %arg8[%c0_19, %c0_20], %32 {strides = array<i32>} : memref<8x32xf32, #tpu.memory_space<vmem>>, vector<8x32xf32>,
    } else {
    }
    %c0 = arith.constant 0 : index
    %c0_1 = arith.constant 0 : index
    %3 = vector.load %arg8[%c0, %c0_1] : memref<8x32xf32, #tpu.memory_space<vmem>>, vector<8x32xf32>
    %c0_2 = arith.constant 0 : index
    %c0_3 = arith.constant 0 : index
    %4 = vector.load %arg5[%c0_2, %c0_3] : memref<32x32xf32, #tpu.memory_space<vmem>>, vector<32x32xf32>
    %cst = arith.constant dense<0.000000e+00> : vector<8x32xf32>
    %5 = tpu.matmul %3, %4, %cst {dimension_numbers = #tpu.dot_dimension_numbers<[1], [0], [0], [1], [0, 0, 1, 1], [], []>} : vector<8x32xf32>, vector<32x32xf32>, vector<8x32xf32> -> vector<8x32xf32>
    %c0_4 = arith.constant 0 : index
    %c0_5 = arith.constant 0 : index
    %6 = vector.load %arg6[%c0_4, %c0_5] : memref<1x32xf32, #tpu.memory_space<vmem>>, vector<1x32xf32>
    %7 = vector.broadcast %6 : vector<1x32xf32> to vector<8x32xf32>
    %8 = arith.addf %5, %7 : vector<8x32xf32>
    %c0_6 = arith.constant 0 : index
    %c0_7 = arith.constant 0 : index
    %9 = vector.load %arg7[%c0_6, %c0_7] : memref<8x32xf32, #tpu.memory_space<vmem>>, vector<8x32xf32>
    tpu.vector_store %arg7[%c0_6, %c0_7], %8 {strides = array<i32>} : memref<8x32xf32, #tpu.memory_space<vmem>>, vector<8x32xf32>,
    return
  }
  func.func @transform_0(%arg0: i32, %arg1: i32) -> (i32, i32) {
    %c0_i32 = arith.constant 0 : i32
    %c0_i32_0 = arith.constant 0 : i32
    return %arg0, %c0_i32 : i32, i32
  }
  func.func @transform_1(%arg0: i32, %arg1: i32) -> (i32, i32) {
    %c0_i32 = arith.constant 0 : i32
    %c0_i32_0 = arith.constant 0 : i32
    %c0_i32_1 = arith.constant 0 : i32
    return %c0_i32, %c0_i32_0 : i32, i32
  }
  func.func @transform_2(%arg0: i32, %arg1: i32) -> (i32, i32) {
    %c0_i32 = arith.constant 0 : i32
    %c0_i32_0 = arith.constant 0 : i32
    %c0_i32_1 = arith.constant 0 : i32
    return %c0_i32, %c0_i32_0 : i32, i32
  }
  func.func @transform_3(%arg0: i32, %arg1: i32) -> (i32, i32) {
    %c0_i32 = arith.constant 0 : i32
    %c0_i32_0 = arith.constant 0 : i32
    return %c0_i32, %arg1 : i32, i32
  }
  func.func @transform_4(%arg0: i32, %arg1: i32) -> (i32, i32) {
    %c0_i32 = arith.constant 0 : i32
    %c0_i32_0 = arith.constant 0 : i32
    return %c0_i32, %arg1 : i32, i32
  }
  func.func @transform_5(%arg0: i32, %arg1: i32) -> (i32, i32) {
    %c0_i32 = arith.constant 0 : i32
    return %arg0, %arg1 : i32, i32
  }
}

</mosaic_0001>

<bundles_post_ra>
// kernel: tpu_custom_call.1
= control target key start
LH: loop header
LB: loop body
LE: loop exit
PB: predicated region body
PF: predicated region fallthrough
CT: control target
= control target key end

     0   :  { %10 = vsyncpa [#allocation4], 0  ;;  %s1069_s0 = inlined_call_operand.hbm [shape: f32[16,32], index: 0, kind: input, shape index: {}]   ;;  %s1070_s1 = inlined_call_operand.vmem [shape: f32[1,32], index: 1, kind: input, shape index: {}]   ;;  %s1071_s2 = inlined_call_operand.vmem [shape: f32[1,32], index: 2, kind: input, shape index: {}]   ;;  %s1072_s3 = inlined_call_operand.hbm [shape: f32[32,32], index: 3, kind: input, shape index: {}]   ;;  %s1073_s4 = inlined_call_operand.vmem [shape: f32[1,32], index: 4, kind: input, shape index: {}]   ;;  %s1074_s5 = inlined_call_operand.hbm [shape: f32[16,32], index: 5, kind: output, shape index: {}]  }
   0x1   :  { %12 = vsyncpa [#allocation4 + $0x1], 0 }
   0x2   :  { %13 = vsyncpa [#allocation7], 0 }
   0x3   :  { %14 = vsyncpa [#allocation5], 0 }
   0x4   :  { %16 = vsyncpa [#allocation5 + $0x1], 0  ;;  %s837_s18 = smov 0   ;;  %s839_s19 = smov 0  }
   0x5   :  { %s841_s20 = smov 0   ;;  %s843_s21 = smov 0  }
   0x6   :  { %s845_s22 = smov 0   ;;  %s847_s23 = smov 0  }
   0x7 LB: > { %s531_s24 = sadd.s32 4294967295, %s797_s23   ;;  %s532_s25 = sadd.s32 4294967294, %s797_s23   ;;  %s797_s23 = sphi %s847_s23, %s22_s23   ;;  %s793_s22 = sphi %s845_s22, %s1098_s22   ;;  %s789_s21 = sphi %s843_s21, %s1097_s21   ;;  %s785_s20 = sphi %s841_s20, %s1096_s20   ;;  %s781_s19 = sphi %s839_s19, %s1095_s19   ;;  %s777_s18 = sphi %s837_s18, %s1094_s18  }
   0x8   : > { %p54_p0 = scmp.ne.s32.totalorder %s781_s19, %s777_s18  ;;  %p871_p1 = scmp.eq.s32.totalorder %s531_s24, 0 }
   0x9   : > { %p875_p2 = scmp.eq.s32.totalorder %s531_s24, 1  ;;  %p180_p3 = scmp.eq.s32.totalorder %s532_s25, 1 }
   0xa   : > { %s1079_s26 = scalar_select %p871_p1, 1, 0 }
   0xb   : > { %s1080_s27 = scalar_select %p875_p2, 1, 0 }
   0xc   : > { %p881_p4 = por %p871_p1, %p54_p0  ;;  %p533_p5 = scmp.ge.s32.totalorder %s797_s23, 1 }
   0xd   : > { %p886_p6 = por %p180_p3, %p54_p0  ;;  %p187_p7 = scmp.lt.s32.totalorder %s797_s23, 3 }
   0xe   : > { %s1081_s28 = scalar_select %p881_p4, 1, 0 }
   0xf   : > { %s1082_s29 = scalar_select %p886_p6, 1, 0 }
  0x10   : > { %p891_p8 = pnand %p533_p5, %p187_p7  ;;  %s799_s6 = smov [#allocation6]  }
  0x11   : > { %s207_s7 = sshll.u32 %s799_s6, 4  ;;  %s34_s9 = sadd.s32 1, %s793_s22  ;;  %s208_s7 = int_to_ptr.vmem [resolvable:$true] %s207_s7 }
  0x12   : > { %s1083_s30 = scalar_select %p891_p8, 1, 0 }
  0x13   : > { %p581_p9 = pneg %p891_p8  ;;  %s653_s12 = scalar_lea.hbm %s1072_s3, 512 }
  0x14   : > { %p654_p12 = scmp.ne.s32.totalorder %s1072_s3, %s653_s12  ;;  %p660_p5 = scmp.lt.u32.totalorder %s653_s12, %s1072_s3 }
  0x15   : > { %p900_p11 = pnand %p581_p9, %p871_p1 }
  0x17   : > { %p655_p13 = pneg %p900_p11 }
  0x19   : > { %p656_p0 = pnand %p655_p13, %p654_p12 }
  0x1b   : > { %p657_p3 = pneg %p656_p0 }
  0x1d   : > { %p662_p7 = pnand %p660_p5, %p657_p3 }
  0x1f   : > { %665 = shalt.err (!%p662_p7)
}
  0x20   : > { %s666_s17 = scalar_lea.vmem %s208_s7, 512  ;;  %p674_p1 = scmp.lt.s32.totalorder %s208_s7, %s208_s7 }
  0x21   : > { %p667_p9 = scmp.ne.s32.totalorder %s208_s7, %s666_s17  ;;  %p675_p4 = scmp.lt.s32.totalorder %s666_s17, %s666_s17 }
  0x23   : > { %p669_p10 = pnand %p667_p9, %p655_p13  ;;  %p676_p8 = por %p675_p4, %p674_p1 }
  0x25   : > { %p670_p6 = pneg %p669_p10 }
  0x27   : > { %p677_p2 = pnand %p676_p8, %p670_p6 }
  0x29   : > { %680 = shalt.err (!%p677_p2)
}
  0x2a   : > { %s800_s24 = smov 128   ;;  %s801_s25 = smov 8  }
  0x2b   : > { %584 = dma.hbm_to_vmem [thread:$0]  (!%p900_p11), %s1072_s3, 512, %s208_s7, [#allocation7], %s800_s24, %s800_s24, %s801_s25  }
  0x2c   : > { %p36_p1 = scmp.ge.s32.totalorder %s34_s9, 2  ;;  %s41_s11 = sadd.s32 1, %s785_s20 }
  0x2d   : > { %p48_p2 = scmp.ne.s32.totalorder %s785_s20, %s781_s19  ;;  %p49_p4 = scmp.eq.s32.totalorder %s797_s23, 0 }
  0x2e   : > { %s1100_s9 = smov (%p36_p1, %s34_s9), 0  ;;  %p1086_p8 = scmp.ne.s32.totalorder %s1080_s27, 0 }
  0x2f   : > { %p927_p6 = por %p49_p4, %p48_p2  ;;  %s38_s8 = ssub.s32 %s793_s22, %s1100_s9 }
  0x30   : > { %p933_p10 = por %p1086_p8, %p48_p2  ;;  %p594_p12 = scmp.lt.s32.totalorder %s797_s23, 2 }
  0x31   : > { %p39_p11 = scmp.eq.s32.totalorder %s38_s8, 0  ;;  %s227_s7 = sand.u32 1, %s785_s20  }
  0x32   : > { %s537_s14 = sshll.u32 %s227_s7, 3  ;;  %s538_s16 = sshll.u32 %s793_s22, 7 }
  0x33   : > { %s942_s15 = scalar_select %p39_p11, %s785_s20, %s41_s11  }
  0x34   : > { %s948_s25 = scalar_lea.hbm %s1069_s0, %s538_s16  ;;  %s231_s27 = scalar_lea.vmem [#allocation3], %s537_s14 }
  0x35   : > { %s238_s6 = sshll.u32 %s231_s27, 4  ;;  %p954_p13 = pnand %p594_p12, %p927_p6  ;;  %s950_s6 = int_to_ptr.vmem [resolvable:$true] %s238_s6 }
  0x36   : > { %s228_s11 = scalar_lea.sflag [#allocation4], %s227_s7  ;;  %s681_s8 = scalar_lea.hbm %s948_s25, 128 }
  0x37   : > { %p682_p0 = scmp.ne.s32.totalorder %s948_s25, %s681_s8  ;;  %p683_p3 = pneg %p954_p13 }
  0x38   : > { %s686_s17 = scalar_lea.hbm %s1069_s0, 256  ;;  %p687_p9 = scmp.lt.u32.totalorder %s948_s25, %s1069_s0 }
  0x39   : > { %p684_p5 = pnand %p683_p3, %p682_p0  ;;  %p688_p1 = scmp.lt.u32.totalorder %s686_s17, %s681_s8 }
  0x3a   : > { %p690_p4 = scmp.lt.u32.totalorder %s681_s8, %s948_s25 }
  0x3b   : > { %p685_p7 = pneg %p684_p5  ;;  %p689_p2 = por %p688_p1, %p687_p9 }
  0x3d   : > { %p691_p6 = por %p690_p4, %p689_p2 }
  0x3f   : > { %p692_p8 = pnand %p691_p6, %p685_p7 }
  0x41   : > { %695 = shalt.err (!%p692_p8)
}
  0x42   : > { %s696_s7 = scalar_lea.vmem %s950_s6, 128  ;;  %s802_s27 = smov [#allocation3]  }
  0x43   : > { %p697_p12 = scmp.ne.s32.totalorder %s950_s6, %s696_s7  ;;  %s701_s14 = sshll.u32 %s802_s27, 4  ;;  %s702_s14 = int_to_ptr.vmem [resolvable:$false] %s701_s14 }
  0x44   : > { %s703_s16 = scalar_lea.vmem %s702_s14, 256  ;;  %p704_p5 = scmp.lt.s32.totalorder %s950_s6, %s702_s14 }
  0x45   : > { %p699_p11 = pnand %p697_p12, %p683_p3  ;;  %p705_p9 = scmp.lt.s32.totalorder %s703_s16, %s696_s7 }
  0x47   : > { %p700_p0 = pneg %p699_p11  ;;  %p706_p1 = por %p705_p9, %p704_p5 }
  0x49   : > { %p707_p2 = pnand %p706_p1, %p700_p0 }
  0x4b   : > { %710 = shalt.err (!%p707_p2)
}
  0x4c   : > { %588 = dma.hbm_to_vmem [thread:$0]  (!%p954_p13), %s948_s25, 128, %s950_s6, %s228_s11  }
  0x4d   : > { %p1089_p7 = scmp.ne.s32.totalorder %s1083_s30, 0 }
  0x4e   : > { %s986_s8 = sand.u32 (!%p1089_p7), 1, %s781_s19   ;;  %p1090_p3 = scmp.ne.s32.totalorder (!%p1089_p7), %s1081_s28, 0 }
  0x4f   : > { %247 = sbr.rel (%p1089_p7) target bundleno = 640 (0x280), region = 40  ;;  %s540_s17 = sshll.u32 (!%p1089_p7), %s986_s8, 3 }
  0x50   : > { %s250_s12 = scalar_lea.sflag (!%p1089_p7), [#allocation4], %s986_s8  ;;  %s253_s24 = scalar_lea.vmem (!%p1089_p7), [#allocation3], %s540_s17 }
  0x56   : > { %764 = dma.done.wait (%p1090_p3), %s250_s12, 128  }
  0x57   : > { %766 = vsyncadd (%p1090_p3), %s250_s12, 4294967168  ;;  %p1091_p13 = scmp.ne.s32.totalorder %s1079_s26, 0 }
  0x59   : > { %768 = dma.done.wait (%p1091_p13), [#allocation7], 512  }
  0x5a   : > { %770 = vsyncadd (%p1091_p13), [#allocation7], 4294966784  ;;  %vm295_vm0 = vcmask 261120   ;;  %v294_v0 = vld [vmem:[%s253_s24] sm:$0xff]  ;;  %v327_v7 = vld [vmem:[#allocation6] sm:$0xff]  ;;  %v803_v10 = vmov 0.0|0.0  }
  0x5b   : > { %v296_v1 = vsel %vm295_vm0, %v294_v0, 0.0  ;;  %v328_v8 = vld [vmem:[#allocation6 + $0x8] sm:$0xff]  ;;  %567 = vmatprep.subr.bf16.mxu0 %v803_v10  ;;  %v329_v11 = vld [vmem:[#allocation6 + $0x10] sm:$0xff]  ;;  %v330_v12 = vld [vmem:[#allocation6 + $0x18] sm:$0xff]  ;;  %vm804_vm1 = vmmov 0   ;;  %v805_v14 = vmov 0.0  }
  0x5c   : > { %297 = vadd.xlane.f32.xlu0 %v296_v1  ;;  %v568_v9 = vpack.c.bf16 %v328_v8, %v327_v7  ;;  %v571_v13 = vpack.c.bf16 %v330_v12, %v329_v11  ;;  %564 = vmatprep.mubr.msk.f32.mxu0 %vm804_vm1, %v805_v14  ;;  %v543_v19 = vld [vmem:[%s1070_s1] ss:$0 sm:$0xff]  ;;  %s548_s11 = sshll.u32 %s789_s21, 7  ;;  %s286_s7 = scalar_lea.vmem [#allocation8], %s540_s17 }
  0x5d   : > { %v544_v21 = vld [vmem:[%s1071_s2] ss:$0 sm:$0xff]  ;;  %s428_s27 = sshll.u32 %s286_s7, 4  ;;  %s1019_s12 = scalar_lea.hbm %s1074_s5, %s548_s11  ;;  %s1021_s27 = int_to_ptr.vmem [resolvable:$true] %s428_s27 }
  0x5e   : > { %569 = vmatpush3.bf16.msra.mxu0 %v568_v9  ;;  %v545_v25 = vld [vmem:[%s1073_s4] ss:$0 sm:$0xff]  ;;  %s414_s24 = scalar_lea.sflag [#allocation5], %s986_s8  ;;  %s711_s21 = scalar_lea.vmem %s1021_s27, 128 }
  0x5f   : > { %570 = vmatprep.subr.bf16.mxu0 %v803_v10  ;;  %p712_p4 = scmp.ne.s32.totalorder %s1021_s27, %s711_s21  ;;  %s806_s17 = smov [#allocation8]  }
  0x60   : > { %s715_s26 = sshll.u32 %s806_s17, 4  ;;  %s716_s26 = int_to_ptr.vmem [resolvable:$false] %s715_s26 }
  0x61   : > { %p713_p6 = pnand %p712_p4, %p933_p10  ;;  %s717_s28 = scalar_lea.vmem %s716_s26, 256 }
  0x62   : > { %572 = vmatpush3.bf16.msra.mxu0 %v571_v13  ;;  %p718_p12 = scmp.lt.s32.totalorder %s1021_s27, %s716_s26  ;;  %p719_p11 = scmp.lt.s32.totalorder %s717_s28, %s711_s21 }
  0x63   : > { %p714_p8 = pneg %p713_p6 }
  0x64   : > { %p720_p0 = por %p719_p11, %p718_p12 }
  0x66   : > { %p721_p5 = pnand %p720_p0, %p714_p8 }
  0xe9   : > { %v298_v2 = vpop.xlane.xlu0 %297 }
  0xea   : > { %v299_v3 = vmul.f32 0.03125, %v298_v2 }
  0xec   : > { %v300_v4 = vsub.f32 %v294_v0, %v299_v3 }
  0xee   : > { %v301_v5 = vmul.f32 %v300_v4, %v300_v4 }
  0xf0   : > { %v302_v6 = vsel %vm295_vm0, %v301_v5, 0.0 }
  0xf1   : > { %303 = vadd.xlane.f32.xlu0 %v302_v6 }
 0x17e   : > { %v304_v15 = vpop.xlane.xlu0 %303 }
 0x17f   : > { %v305_v16 = vmul.f32 0.03125, %v304_v15 }
 0x181   : > { %v306_v17 = vadd.f32 1e-06, %v305_v16 }
 0x183   : > { %651 = vrsqrt.f32 %v306_v17 }
 0x18d   : > { %v652_v18 = vpop.eup %651 }
 0x18e   : > { %v308_v20 = vmul.f32 %v652_v18, %v300_v4 }
 0x190   : > { %v316_v22 = vmul.f32 %v543_v19, %v308_v20 }
 0x192   : > { %v324_v23 = vadd.f32 %v544_v21, %v316_v22 }
 0x194   : > { %325 = vst.msk [vmem:[#allocation2] sm:$0xff] %vm295_vm0, %v324_v23 }
 0x19b   : > { %v326_v24 = vld [vmem:[#allocation2] sm:$0xff] }
 0x19c   : > { %565 = vmatmul.mubr.msk.f32.vlgmr.msra.gmra.mrb[0].mxu0 %vm295_vm0, %v326_v24 }
 0x26f   : > { %v408_v26 = vpop.f32.mrb[0].mxu0 }
 0x270   : > { %v409_v27 = vadd.f32 %v545_v25, %v408_v26  ;;  %v566_v28 = vpop.f32.mrb[1].mxu0 }
 0x272   : > { %412 = vst.msk [vmem:[%s286_s7] sm:$0xff] %vm295_vm0, %v409_v27 }
 0x273   : > { %724 = shalt.err (!%p721_p5)
}
 0x274   : > { %s725_s8 = scalar_lea.hbm %s1019_s12, 128  ;;  %s729_s6 = scalar_lea.hbm %s1074_s5, 256 }
 0x275   : > { %p726_p9 = scmp.ne.s32.totalorder %s1019_s12, %s725_s8  ;;  %p730_p7 = scmp.lt.u32.totalorder %s1019_s12, %s1074_s5 }
 0x276   : > { %p731_p3 = scmp.lt.u32.totalorder %s729_s6, %s725_s8  ;;  %p733_p4 = scmp.lt.u32.totalorder %s725_s8, %s1019_s12 }
 0x277   : > { %p727_p1 = pnand %p726_p9, %p933_p10 }
 0x278   : > { %p732_p13 = por %p731_p3, %p730_p7 }
 0x279   : > { %p728_p2 = pneg %p727_p1 }
 0x27a   : > { %p734_p6 = por %p733_p4, %p732_p13 }
 0x27c   : > { %p735_p8 = pnand %p734_p6, %p728_p2 }
 0x27e   : > { %738 = shalt.err (!%p735_p8)
}
 0x27f   : > { %579 = dma.vmem_to_hbm [thread:$0]  (%p933_p10), %s1021_s27, 128, %s1019_s12, %s414_s24  }
 0x280 PF: > { %s440_s7 = sand.u32 1, %s777_s18   ;;  %p1092_p12 = scmp.ne.s32.totalorder %s1082_s29, 0 }
 0x281   : > { %p1093_p11 = scmp.ge.s32.totalorder %s797_s23, 2  ;;  %s441_s14 = scalar_lea.sflag [#allocation5], %s440_s7 }
 0x283   : > { %p590_p0 = pnand %p1093_p11, %p1092_p12 }
 0x285   : > { %772 = dma.done.wait (!%p590_p0), %s441_s14, 128  }
 0x286   : > { %774 = vsyncadd (!%p590_p0), %s441_s14, 4294967168  ;;  %s22_s23 = sadd.s32 1, %s797_s23   ;;  %s1094_s18 = smov %s781_s19 }
 0x287   : > { %p19_p5 = scmp.ge.s32.totalorder %s22_s23, 4   ;;  %s1095_s19 = smov %s785_s20 }
 0x288   : > { %s1096_s20 = smov %s942_s15  ;;  %s1097_s21 = smov %s793_s22 }
 0x289   : > { %s1098_s22 = smov %s1100_s9  ;;  %21 = sbr.rel (!%p19_p5) target bundleno = 7 (0x7), region = 97 }
 0x290   :  { %446 = vsyncpa [#allocation4], 1 }
 0x291   :  { %448 = vsyncpa [#allocation4 + $0x1], 1 }
 0x292   :  { %449 = vsyncpa [#allocation7], 1 }
 0x293   :  { %450 = vsyncpa [#allocation5], 1 }
 0x294   :  { %452 = vsyncpa [#allocation5 + $0x1], 1 }

</bundles_post_ra>
